<compile_context>
chip_gen: v7x
topology: tpu7x:2x2x1
jax: 0.10.0
libtpu: 0.0.40
codegen_flags: <defaults>
</compile_context>

<pallas_src>
import functools

import jax
import jax.numpy as jnp
import numpy as np
from jax.experimental import pallas as pl
from jax.experimental.pallas import tpu as pltpu

LOG_STD_MAX = 2.0
LOG_STD_MIN = -20.0

OUT_PAD = 128  # lane width of the packed output slab / padded head width


def actor_kernel(state_ref, w1_ref, b1_ref, w2_ref, b2_ref,
                 wh_ref, bh_ref, eps_ref, out_ref, *, act_dim):
    out_pad = out_ref.shape[-1]

    x = state_ref[...]                                            # (TB, S)

    # --- MLPEncoder: Linear -> ReLU -> Linear -> ReLU ---
    h1 = jnp.dot(x, w1_ref[...], preferred_element_type=jnp.float32) + b1_ref[...]
    h1 = jnp.maximum(h1, 0.0)
    h2 = jnp.dot(h1, w2_ref[...], preferred_element_type=jnp.float32) + b2_ref[...]
    h2 = jnp.maximum(h2, 0.0)                                     # (TB, H)

    # --- fused heads: one MXU matmul, columns [0,128)=mu(padded), [128,256)=log_std ---
    y = jnp.dot(h2, wh_ref[...], preferred_element_type=jnp.float32) + bh_ref[...]
    mu = y[:, :out_pad]                                           # vreg-aligned slice
    log_std = jnp.tanh(y[:, out_pad:])
    log_std = LOG_STD_MIN + 0.5 * (LOG_STD_MAX - LOG_STD_MIN) * (log_std + 1.0)
    std = jnp.exp(log_std)

    # --- rsample (reparameterized): action = mu + std * eps ---
    # determ=True is reproduced by passing eps = zeros.
    eps = eps_ref[...]                                            # (TB, 128), zero-padded
    a = mu + std * eps                                            # padded lanes stay 0

    # --- Normal(mu, std).log_prob(a) with z = (a - mu)/std == eps,
    #     plus tanh-squash correction 2*(log 2 - a - softplus(-2a)) ---
    neg2a = -2.0 * a
    softplus = jnp.maximum(neg2a, 0.0) + jnp.log1p(jnp.exp(-jnp.abs(neg2a)))
    per = (-0.5 * eps * eps - log_std - 0.5 * jnp.log(2.0 * jnp.pi)) \
          - 2.0 * (jnp.log(2.0) - a - softplus)

    col = jax.lax.broadcasted_iota(jnp.int32, per.shape, 1)
    per = jnp.where(col < act_dim, per, 0.0)                      # mask padded lanes
    lp_sum = jnp.sum(per, axis=-1, keepdims=True)                 # (TB, 1)

    action = jnp.tanh(a)                                          # padded lanes = tanh(0) = 0

    # pack: lanes [0, act_dim) = tanh(action), lane act_dim = log_prob, rest 0
    out_ref[...] = jnp.where(col == act_dim, lp_sum, action)      # one full 128-lane store


def actor_forward(state, params, eps, *, block_b=512):
    """state: (B, state_dim) f32; eps: (B, act_dim) f32 (zeros => determ=True)."""
    B, S = state.shape
    A = eps.shape[1]
    H = params["w1"].shape[1]

    # Batch tile: multiple of 8 (f32 sublane); large TB amortizes ~0.35us/step overhead.
    TB = max(8, (min(block_b, B) // 8) * 8)
    n_blocks = pl.cdiv(B, TB)
    Bp = n_blocks * TB

    if Bp != B:
        state = jnp.pad(state, ((0, Bp - B), (0, 0)))
        eps = jnp.pad(eps, ((0, Bp - B), (0, 0)))
    # Lane-pad eps to 128 so all elementwise math runs full-width and the packed
    # output store is a single unmasked 128-lane store.
    eps_p = jnp.pad(eps, ((0, 0), (0, OUT_PAD - A)))

    flops = 2 * Bp * (S * H + H * H + H * 2 * OUT_PAD)
    bytes_accessed = 4 * (Bp * (S + 2 * OUT_PAD)
                          + S * H + H + H * H + H + H * 2 * OUT_PAD + 2 * OUT_PAD)
    transcendentals = 5 * Bp * OUT_PAD  # tanh x2, exp x2, log1p

    kernel = functools.partial(actor_kernel, act_dim=A)
    out = pl.pallas_call(
        kernel,
        out_shape=jax.ShapeDtypeStruct((Bp, OUT_PAD), jnp.float32),
        grid=(n_blocks,),
        in_specs=[
            pl.BlockSpec((TB, S), lambda i: (i, 0)),            # state: tiled over batch
            pl.BlockSpec((S, H), lambda i: (0, 0)),             # w1: resident
            pl.BlockSpec((1, H), lambda i: (0, 0)),             # b1: resident
            pl.BlockSpec((H, H), lambda i: (0, 0)),             # w2: resident
            pl.BlockSpec((1, H), lambda i: (0, 0)),             # b2: resident
            pl.BlockSpec((H, 2 * OUT_PAD), lambda i: (0, 0)),   # fused heads W: resident
            pl.BlockSpec((1, 2 * OUT_PAD), lambda i: (0, 0)),   # fused heads b: resident
            pl.BlockSpec((TB, OUT_PAD), lambda i: (i, 0)),      # eps: tiled over batch
        ],
        out_specs=pl.BlockSpec((TB, OUT_PAD), lambda i: (i, 0)),
        compiler_params=pltpu.CompilerParams(
            dimension_semantics=("parallel",)),                 # megacore on v7x
        cost_estimate=pl.CostEstimate(
            flops=flops, transcendentals=transcendentals,
            bytes_accessed=bytes_accessed),
    )(state, params["w1"], params["b1"], params["w2"], params["b2"],
      params["wh"], params["bh"], eps_p)

    action = out[:B, :A]
    log_prob = out[:B, A:A + 1]
    return action, log_prob


def init_params(key, state_dim, hid_size, act_dim, out_pad=OUT_PAD):
    """Deterministic init mimicking nn.Linear default (uniform +-1/sqrt(fan_in))."""
    def linear(k, fan_in, fan_out):
        kw, kb = jax.random.split(k)
        bound = 1.0 / np.sqrt(fan_in)
        w = jax.random.uniform(kw, (fan_in, fan_out), jnp.float32, -bound, bound)
        b = jax.random.uniform(kb, (1, fan_out), jnp.float32, -bound, bound)
        return w, b

    k1, k2, k3, k4 = jax.random.split(key, 4)
    w1, b1 = linear(k1, state_dim, hid_size)
    w2, b2 = linear(k2, hid_size, hid_size)
    wmu, bmu = linear(k3, hid_size, act_dim)
    wls, bls = linear(k4, hid_size, act_dim)

    # Fuse + lane-pad the two heads ONCE at init time (no per-call cost):
    #   columns [0, act_dim)                -> mu
    #   columns [out_pad, out_pad+act_dim)  -> log_std
    wh = jnp.zeros((hid_size, 2 * out_pad), jnp.float32)
    wh = wh.at[:, :act_dim].set(wmu).at[:, out_pad:out_pad + act_dim].set(wls)
    bh = jnp.zeros((1, 2 * out_pad), jnp.float32)
    bh = bh.at[:, :act_dim].set(bmu).at[:, out_pad:out_pad + act_dim].set(bls)

    return dict(w1=w1, b1=b1, w2=w2, b2=b2, wh=wh, bh=bh,
                wmu=wmu, bmu=bmu, wls=wls, bls=bls)


def actor_reference(state, params, eps):
    """Pure-JAX reference of the same forward (unfused heads), for correctness."""
    h1 = jnp.maximum(state @ params["w1"] + params["b1"], 0.0)
    h2 = jnp.maximum(h1 @ params["w2"] + params["b2"], 0.0)
    mu = h2 @ params["wmu"] + params["bmu"]
    log_std = jnp.tanh(h2 @ params["wls"] + params["bls"])
    log_std = LOG_STD_MIN + 0.5 * (LOG_STD_MAX - LOG_STD_MIN) * (log_std + 1.0)
    std = jnp.exp(log_std)
    a = mu + std * eps
    lp = (-0.5 * ((a - mu) / std) ** 2 - log_std
          - 0.5 * jnp.log(2.0 * jnp.pi)).sum(-1, keepdims=True)
    lp -= (2.0 * (jnp.log(2.0) - a - jax.nn.softplus(-2.0 * a))).sum(-1, keepdims=True)
    return jnp.tanh(a), lp


if __name__ == "__main__":
    # Small shapes consistent with the module: Linear encoder.
    B, STATE_DIM, HID, ACT = 8, 16, 32, 8

    key = jax.random.PRNGKey(0)
    k_params, k_state, k_eps = jax.random.split(key, 3)

    params = init_params(k_params, STATE_DIM, HID, ACT)
    state = jax.random.normal(k_state, (B, STATE_DIM), jnp.float32)
    # Stochastic branch (determ=False): reparameterization noise precomputed in JAX.
    eps = jax.random.normal(k_eps, (B, ACT), jnp.float32)
    # TODO(synk): determ=True is obtained by passing eps = jnp.zeros_like(eps).

    action, log_prob = jax.jit(functools.partial(actor_forward, params=params))(state, eps=eps)
    jax.block_until_ready((action, log_prob))

    ref_action, ref_logprob = actor_reference(state, params, eps)
    assert action.shape == (B, ACT) and log_prob.shape == (B, 1)
    np.testing.assert_allclose(np.asarray(action), np.asarray(ref_action),
                               rtol=1e-5, atol=1e-5)
    np.testing.assert_allclose(np.asarray(log_prob), np.asarray(ref_logprob),
                               rtol=1e-4, atol=1e-4)
    print("KERNEL_OK")
</pallas_src>

<mosaic_0001>
module attributes {stable_mosaic.version = 11 : i64} {
  func.func @actor_kernel(%arg0: i32, %arg1: memref<8x16xf32, #tpu.memory_space<vmem>>, %arg2: memref<16x32xf32, #tpu.memory_space<vmem>>, %arg3: memref<1x32xf32, #tpu.memory_space<vmem>>, %arg4: memref<32x32xf32, #tpu.memory_space<vmem>>, %arg5: memref<1x32xf32, #tpu.memory_space<vmem>>, %arg6: memref<32x256xf32, #tpu.memory_space<vmem>>, %arg7: memref<1x256xf32, #tpu.memory_space<vmem>>, %arg8: memref<8x128xf32, #tpu.memory_space<vmem>>, %arg9: memref<8x128xf32, #tpu.memory_space<vmem>>) attributes {dimension_semantics = [#tpu.dimension_semantics<parallel>], iteration_bounds = array<i64: 1>, scalar_prefetch = 0 : i64, scratch_operands = 0 : i64, tpu.core_type = #tpu.core_type<tc>, window_params = [{transform_indices = @transform_0, window_bounds = array<i64: 8, 16>}, {pipeline_mode = #tpu.pipeline_mode<synchronous>, transform_indices = @transform_1, window_bounds = array<i64: 16, 32>}, {pipeline_mode = #tpu.pipeline_mode<synchronous>, transform_indices = @transform_2, window_bounds = array<i64: 1, 32>}, {pipeline_mode = #tpu.pipeline_mode<synchronous>, transform_indices = @transform_3, window_bounds = array<i64: 32, 32>}, {pipeline_mode = #tpu.pipeline_mode<synchronous>, transform_indices = @transform_4, window_bounds = array<i64: 1, 32>}, {pipeline_mode = #tpu.pipeline_mode<synchronous>, transform_indices = @transform_5, window_bounds = array<i64: 32, 256>}, {pipeline_mode = #tpu.pipeline_mode<synchronous>, transform_indices = @transform_6, window_bounds = array<i64: 1, 256>}, {transform_indices = @transform_7, window_bounds = array<i64: 8, 128>}, {transform_indices = @transform_8, window_bounds = array<i64: 8, 128>}]} {
    %c0 = arith.constant 0 : index
    %c0_0 = arith.constant 0 : index
    %0 = vector.load %arg1[%c0, %c0_0] : memref<8x16xf32, #tpu.memory_space<vmem>>, vector<8x16xf32>
    %c0_1 = arith.constant 0 : index
    %c0_2 = arith.constant 0 : index
    %1 = vector.load %arg2[%c0_1, %c0_2] : memref<16x32xf32, #tpu.memory_space<vmem>>, vector<16x32xf32>
    %cst = arith.constant dense<0.000000e+00> : vector<8x32xf32>
    %2 = tpu.matmul %0, %1, %cst {dimension_numbers = #tpu.dot_dimension_numbers<[1], [0], [0], [1], [0, 0, 1, 1], [], []>} : vector<8x16xf32>, vector<16x32xf32>, vector<8x32xf32> -> vector<8x32xf32>
    %c0_3 = arith.constant 0 : index
    %c0_4 = arith.constant 0 : index
    %3 = vector.load %arg3[%c0_3, %c0_4] : memref<1x32xf32, #tpu.memory_space<vmem>>, vector<1x32xf32>
    %4 = vector.broadcast %3 : vector<1x32xf32> to vector<8x32xf32>
    %5 = arith.addf %2, %4 : vector<8x32xf32>
    %cst_5 = arith.constant 0.000000e+00 : f32
    %6 = vector.broadcast %cst_5 : f32 to vector<8x32xf32>
    %7 = arith.maximumf %5, %6 : vector<8x32xf32>
    %c0_6 = arith.constant 0 : index
    %c0_7 = arith.constant 0 : index
    %8 = vector.load %arg4[%c0_6, %c0_7] : memref<32x32xf32, #tpu.memory_space<vmem>>, vector<32x32xf32>
    %cst_8 = arith.constant dense<0.000000e+00> : vector<8x32xf32>
    %9 = tpu.matmul %7, %8, %cst_8 {dimension_numbers = #tpu.dot_dimension_numbers<[1], [0], [0], [1], [0, 0, 1, 1], [], []>} : vector<8x32xf32>, vector<32x32xf32>, vector<8x32xf32> -> vector<8x32xf32>
    %c0_9 = arith.constant 0 : index
    %c0_10 = arith.constant 0 : index
    %10 = vector.load %arg5[%c0_9, %c0_10] : memref<1x32xf32, #tpu.memory_space<vmem>>, vector<1x32xf32>
    %11 = vector.broadcast %10 : vector<1x32xf32> to vector<8x32xf32>
    %12 = arith.addf %9, %11 : vector<8x32xf32>
    %cst_11 = arith.constant 0.000000e+00 : f32
    %13 = vector.broadcast %cst_11 : f32 to vector<8x32xf32>
    %14 = arith.maximumf %12, %13 : vector<8x32xf32>
    %c0_12 = arith.constant 0 : index
    %c0_13 = arith.constant 0 : index
    %15 = vector.load %arg6[%c0_12, %c0_13] : memref<32x256xf32, #tpu.memory_space<vmem>>, vector<32x256xf32>
    %cst_14 = arith.constant dense<0.000000e+00> : vector<8x256xf32>
    %16 = tpu.matmul %14, %15, %cst_14 {dimension_numbers = #tpu.dot_dimension_numbers<[1], [0], [0], [1], [0, 0, 1, 1], [], []>} : vector<8x32xf32>, vector<32x256xf32>, vector<8x256xf32> -> vector<8x256xf32>
    %c0_15 = arith.constant 0 : index
    %c0_16 = arith.constant 0 : index
    %17 = vector.load %arg7[%c0_15, %c0_16] : memref<1x256xf32, #tpu.memory_space<vmem>>, vector<1x256xf32>
    %18 = vector.broadcast %17 : vector<1x256xf32> to vector<8x256xf32>
    %19 = arith.addf %16, %18 : vector<8x256xf32>
    %20 = vector.extract_strided_slice %19 {offsets = [0, 0], sizes = [8, 128], strides = [1, 1]} : vector<8x256xf32> to vector<8x128xf32>
    %21 = vector.extract_strided_slice %19 {offsets = [0, 128], sizes = [8, 128], strides = [1, 1]} : vector<8x256xf32> to vector<8x128xf32>
    %22 = math.tanh %21 : vector<8x128xf32>
    %cst_17 = arith.constant 1.000000e+00 : f32
    %23 = vector.broadcast %cst_17 : f32 to vector<8x128xf32>
    %24 = arith.addf %22, %23 : vector<8x128xf32>
    %cst_18 = arith.constant 1.100000e+01 : f32
    %25 = vector.broadcast %cst_18 : f32 to vector<8x128xf32>
    %26 = arith.mulf %25, %24 : vector<8x128xf32>
    %cst_19 = arith.constant -2.000000e+01 : f32
    %27 = vector.broadcast %cst_19 : f32 to vector<8x128xf32>
    %28 = arith.addf %27, %26 : vector<8x128xf32>
    %29 = math.exp %28 : vector<8x128xf32>
    %c0_20 = arith.constant 0 : index
    %c0_21 = arith.constant 0 : index
    %30 = vector.load %arg8[%c0_20, %c0_21] : memref<8x128xf32, #tpu.memory_space<vmem>>, vector<8x128xf32>
    %31 = arith.mulf %29, %30 : vector<8x128xf32>
    %32 = arith.addf %20, %31 : vector<8x128xf32>
    %cst_22 = arith.constant -2.000000e+00 : f32
    %33 = vector.broadcast %cst_22 : f32 to vector<8x128xf32>
    %34 = arith.mulf %33, %32 : vector<8x128xf32>
    %cst_23 = arith.constant 0.000000e+00 : f32
    %35 = vector.broadcast %cst_23 : f32 to vector<8x128xf32>
    %36 = arith.maximumf %34, %35 : vector<8x128xf32>
    %37 = math.absf %34 : vector<8x128xf32>
    %cst_24 = arith.constant 0.000000e+00 : f32
    %38 = vector.broadcast %cst_24 : f32 to vector<8x128xf32>
    %39 = arith.subf %38, %37 : vector<8x128xf32>
    %40 = math.exp %39 : vector<8x128xf32>
    %41 = math.log1p %40 : vector<8x128xf32>
    %42 = arith.addf %36, %41 : vector<8x128xf32>
    %cst_25 = arith.constant -5.000000e-01 : f32
    %43 = vector.broadcast %cst_25 : f32 to vector<8x128xf32>
    %44 = arith.mulf %43, %30 : vector<8x128xf32>
    %45 = arith.mulf %44, %30 : vector<8x128xf32>
    %46 = arith.subf %45, %28 : vector<8x128xf32>
    %cst_26 = arith.constant 6.28318548 : f32
    %47 = math.log %cst_26 : f32
    %cst_27 = arith.constant 5.000000e-01 : f32
    %48 = arith.mulf %cst_27, %47 : f32
    %49 = vector.broadcast %48 : f32 to vector<8x128xf32>
    %50 = arith.subf %46, %49 : vector<8x128xf32>
    %cst_28 = arith.constant 2.000000e+00 : f32
    %51 = math.log %cst_28 : f32
    %52 = vector.broadcast %51 : f32 to vector<8x128xf32>
    %53 = arith.subf %52, %32 : vector<8x128xf32>
    %54 = arith.subf %53, %42 : vector<8x128xf32>
    %cst_29 = arith.constant 2.000000e+00 : f32
    %55 = vector.broadcast %cst_29 : f32 to vector<8x128xf32>
    %56 = arith.mulf %55, %54 : vector<8x128xf32>
    %57 = arith.subf %50, %56 : vector<8x128xf32>
    %58 = tpu.iota {dimensions = array<i32: 1>} : vector<8x128xi32>
    %c8_i32 = arith.constant 8 : i32
    %59 = vector.broadcast %c8_i32 : i32 to vector<8x128xi32>
    %60 = arith.cmpi slt, %58, %59 : vector<8x128xi32>
    %cst_30 = arith.constant 0.000000e+00 : f32
    %61 = vector.broadcast %cst_30 : f32 to vector<8x128xf32>
    %62 = arith.select %60, %57, %61 : vector<8x128xi1>, vector<8x128xf32>
    %cst_31 = arith.constant dense<0.000000e+00> : vector<8xf32>
    %63 = vector.multi_reduction <add>, %62, %cst_31 [1] : vector<8x128xf32> to vector<8xf32>
    %64 = vector.shape_cast %63 : vector<8xf32> to vector<8x1xf32>
    %65 = math.tanh %32 : vector<8x128xf32>
    %c8_i32_32 = arith.constant 8 : i32
    %66 = vector.broadcast %c8_i32_32 : i32 to vector<8x128xi32>
    %67 = arith.cmpi eq, %58, %66 : vector<8x128xi32>
    %68 = vector.shape_cast %64 : vector<8x1xf32> to vector<8x1xf32>
    %69 = vector.broadcast %68 : vector<8x1xf32> to vector<8x128xf32>
    %70 = arith.select %67, %69, %65 : vector<8x128xi1>, vector<8x128xf32>
    %c0_33 = arith.constant 0 : index
    %c0_34 = arith.constant 0 : index
    %71 = vector.load %arg9[%c0_33, %c0_34] : memref<8x128xf32, #tpu.memory_space<vmem>>, vector<8x128xf32>
    tpu.vector_store %arg9[%c0_33, %c0_34], %70 {strides = array<i32>} : memref<8x128xf32, #tpu.memory_space<vmem>>, vector<8x128xf32>,
    return
  }
  func.func @transform_0(%arg0: i32) -> (i32, i32) {
    %c0_i32 = arith.constant 0 : i32
    %c0_i32_0 = arith.constant 0 : i32
    return %arg0, %c0_i32 : i32, i32
  }
  func.func @transform_1(%arg0: i32) -> (i32, i32) {
    %c0_i32 = arith.constant 0 : i32
    %c0_i32_0 = arith.constant 0 : i32
    %c0_i32_1 = arith.constant 0 : i32
    return %c0_i32, %c0_i32_0 : i32, i32
  }
  func.func @transform_2(%arg0: i32) -> (i32, i32) {
    %c0_i32 = arith.constant 0 : i32
    %c0_i32_0 = arith.constant 0 : i32
    %c0_i32_1 = arith.constant 0 : i32
    return %c0_i32, %c0_i32_0 : i32, i32
  }
  func.func @transform_3(%arg0: i32) -> (i32, i32) {
    %c0_i32 = arith.constant 0 : i32
    %c0_i32_0 = arith.constant 0 : i32
    %c0_i32_1 = arith.constant 0 : i32
    return %c0_i32, %c0_i32_0 : i32, i32
  }
  func.func @transform_4(%arg0: i32) -> (i32, i32) {
    %c0_i32 = arith.constant 0 : i32
    %c0_i32_0 = arith.constant 0 : i32
    %c0_i32_1 = arith.constant 0 : i32
    return %c0_i32, %c0_i32_0 : i32, i32
  }
  func.func @transform_5(%arg0: i32) -> (i32, i32) {
    %c0_i32 = arith.constant 0 : i32
    %c0_i32_0 = arith.constant 0 : i32
    %c0_i32_1 = arith.constant 0 : i32
    return %c0_i32, %c0_i32_0 : i32, i32
  }
  func.func @transform_6(%arg0: i32) -> (i32, i32) {
    %c0_i32 = arith.constant 0 : i32
    %c0_i32_0 = arith.constant 0 : i32
    %c0_i32_1 = arith.constant 0 : i32
    return %c0_i32, %c0_i32_0 : i32, i32
  }
  func.func @transform_7(%arg0: i32) -> (i32, i32) {
    %c0_i32 = arith.constant 0 : i32
    %c0_i32_0 = arith.constant 0 : i32
    return %arg0, %c0_i32 : i32, i32
  }
  func.func @transform_8(%arg0: i32) -> (i32, i32) {
    %c0_i32 = arith.constant 0 : i32
    %c0_i32_0 = arith.constant 0 : i32
    return %arg0, %c0_i32 : i32, i32
  }
}

</mosaic_0001>

<bundles_post_ra>
// kernel: actor_forward.1
= control target key start
LH: loop header
LB: loop body
LE: loop exit
PB: predicated region body
PF: predicated region fallthrough
CT: control target
= control target key end

     0   :  { %13 = vsyncpa [#allocation3], 0  ;;  %s689_s0 = inlined_call_operand.hbm [shape: f32[8,16], index: 0, kind: input, shape index: {}]   ;;  %s690_s1 = inlined_call_operand.hbm [shape: f32[16,32], index: 1, kind: input, shape index: {}]   ;;  %s691_s2 = inlined_call_operand.hbm [shape: f32[1,32], index: 2, kind: input, shape index: {}]   ;;  %s692_s3 = inlined_call_operand.vmem [shape: f32[32,32], index: 3, kind: input, shape index: {}]   ;;  %s693_s4 = inlined_call_operand.vmem [shape: f32[1,32], index: 4, kind: input, shape index: {}]   ;;  %s694_s5 = inlined_call_operand.hbm [shape: f32[32,256], index: 5, kind: input, shape index: {}]   ;;  %s695_s6 = inlined_call_operand.vmem [shape: f32[1,256], index: 6, kind: input, shape index: {}]   ;;  %s696_s7 = inlined_call_operand.vmem [shape: f32[8,128], index: 7, kind: input, shape index: {}]   ;;  %s697_s8 = inlined_call_operand.vmem [shape: f32[8,128], index: 8, kind: output, shape index: {}]  }
   0x1   :  { %14 = vsyncpa [#allocation5], 0 }
   0x2   :  { %15 = vsyncpa [#allocation8], 0  ;;  %s559_s27 = smov [#allocation4]   ;;  %s465_s9 = scalar_lea.hbm %s690_s1, 256 }
   0x3   :  { %s31_s28 = sshll.u32 %s559_s27, 4  ;;  %p466_p0 = scmp.ne.s32.totalorder %s690_s1, %s465_s9  ;;  %s32_s28 = int_to_ptr.vmem [resolvable:$true] %s31_s28 }
   0x4   :  { %p469_p1 = scmp.lt.u32.totalorder %s465_s9, %s690_s1 }
   0x6   :  { %p471_p2 = pnand %p469_p1, %p466_p0 }
   0x8   :  { %474 = shalt.err (!%p471_p2)
}
   0x9   :  { %s475_s14 = scalar_lea.vmem %s32_s28, 256  ;;  %p480_p4 = scmp.lt.s32.totalorder %s32_s28, %s32_s28 }
   0xa   :  { %p476_p3 = scmp.ne.s32.totalorder %s32_s28, %s475_s14  ;;  %p481_p5 = scmp.lt.s32.totalorder %s475_s14, %s475_s14 }
   0xc   :  { %p482_p6 = por %p481_p5, %p480_p4 }
   0xe   :  { %p483_p7 = pnand %p482_p6, %p476_p3 }
  0x10   :  { %486 = shalt.err (!%p483_p7)
}
  0x11   :  { %s560_s15 = smov 128   ;;  %s561_s16 = smov 8  }
  0x12   :  { %37 = dma.hbm_to_vmem [thread:$0]  %s690_s1, 256, %s32_s28, [#allocation5], %s560_s15, %s560_s15, %s561_s16  }
  0x13   :  { %s562_s19 = smov [#allocation2]   ;;  %s563_s21 = smov [#allocation6]  }
  0x14   :  { %s22_s20 = sshll.u32 %s562_s19, 4  ;;  %s44_s22 = sshll.u32 %s563_s21, 4  ;;  %s23_s20 = int_to_ptr.vmem [resolvable:$true] %s22_s20  ;;  %s45_s22 = int_to_ptr.vmem [resolvable:$true] %s44_s22 }
  0x15   :  { %s487_s25 = scalar_lea.hbm %s689_s0, 128 }
  0x16   :  { %p488_p8 = scmp.ne.s32.totalorder %s689_s0, %s487_s25  ;;  %p491_p9 = scmp.lt.u32.totalorder %s487_s25, %s689_s0 }
  0x18   :  { %p493_p10 = pnand %p491_p9, %p488_p8 }
  0x1a   :  { %496 = shalt.err (!%p493_p10)
}
  0x1b   :  { %s497_s1 = scalar_lea.vmem %s23_s20, 128  ;;  %p502_p12 = scmp.lt.s32.totalorder %s23_s20, %s23_s20 }
  0x1c   :  { %p498_p11 = scmp.ne.s32.totalorder %s23_s20, %s497_s1  ;;  %p503_p13 = scmp.lt.s32.totalorder %s497_s1, %s497_s1 }
  0x1e   :  { %p504_p0 = por %p503_p13, %p502_p12 }
  0x20   :  { %p505_p1 = pnand %p504_p0, %p498_p11 }
  0x22   :  { %508 = shalt.err (!%p505_p1)
}
  0x23   :  { %25 = dma.hbm_to_vmem [thread:$0]  %s689_s0, 128, %s23_s20, [#allocation3]  }
  0x24   :  { %s509_s12 = scalar_lea.hbm %s691_s2, 16 }
  0x25   :  { %p510_p2 = scmp.ne.s32.totalorder %s691_s2, %s509_s12  ;;  %p513_p3 = scmp.lt.u32.totalorder %s509_s12, %s691_s2 }
  0x27   :  { %p515_p4 = pnand %p513_p3, %p510_p2 }
  0x29   :  { %518 = shalt.err (!%p515_p4)
}
  0x2a   :  { %s519_s17 = scalar_lea.vmem %s45_s22, 16  ;;  %s523_s18 = scalar_lea.vmem %s45_s22, 32 }
  0x2b   :  { %p520_p5 = scmp.ne.s32.totalorder %s45_s22, %s519_s17  ;;  %p524_p6 = scmp.lt.s32.totalorder %s45_s22, %s45_s22 }
  0x2c   :  { %p525_p7 = scmp.lt.s32.totalorder %s523_s18, %s519_s17 }
  0x2e   :  { %p526_p8 = por %p525_p7, %p524_p6 }
  0x30   :  { %p527_p9 = pnand %p526_p8, %p520_p5 }
  0x32   :  { %530 = shalt.err (!%p527_p9)
}
  0x33   :  { %47 = dma.hbm_to_vmem [thread:$0]  %s691_s2, 16, %s45_s22, [#allocation5]  }
  0x34   :  { %s564_s20 = smov [#allocation7]   ;;  %s531_s25 = scalar_lea.hbm %s694_s5, 1024 }
  0x35   :  { %s57_s21 = sshll.u32 %s564_s20, 4  ;;  %p532_p10 = scmp.ne.s32.totalorder %s694_s5, %s531_s25  ;;  %s58_s21 = int_to_ptr.vmem [resolvable:$true] %s57_s21 }
  0x36   :  { %p535_p11 = scmp.lt.u32.totalorder %s531_s25, %s694_s5 }
  0x38   :  { %p537_p12 = pnand %p535_p11, %p532_p10 }
  0x3a   :  { %540 = shalt.err (!%p537_p12)
}
  0x3b   :  { %s541_s1 = scalar_lea.vmem %s58_s21, 1024  ;;  %p546_p0 = scmp.lt.s32.totalorder %s58_s21, %s58_s21 }
  0x3c   :  { %p542_p13 = scmp.ne.s32.totalorder %s58_s21, %s541_s1  ;;  %p547_p1 = scmp.lt.s32.totalorder %s541_s1, %s541_s1 }
  0x3e   :  { %p548_p2 = por %p547_p1, %p546_p0 }
  0x40   :  { %p549_p3 = pnand %p548_p2, %p542_p13 }
  0x42   :  { %552 = shalt.err (!%p549_p3)
}
  0x43   :  { %s565_s2 = smov 256   ;;  %s566_s22 = smov 16  }
  0x44   :  { %63 = dma.hbm_to_vmem [thread:$0]  %s694_s5, 1024, %s58_s21, [#allocation8], %s565_s2, %s565_s2, %s566_s22  }
  0x45   :  { %553 = dma.done.wait [#allocation3], 128  }
  0x46   :  { %554 = vsyncadd [#allocation3], 4294967168 }
  0x47   :  { %555 = dma.done.wait [#allocation5], 272  }
  0x48   :  { %556 = vsyncadd [#allocation5], 4294967024 }
  0x49   :  { %557 = dma.done.wait [#allocation8], 1024  }
  0x4a   :  { %558 = vsyncadd [#allocation8], 4294966272  ;;  %v567_v0 = vmov 0.0|0.0   ;;  %vm568_vm0 = vmmov 0   ;;  %v569_v1 = vmov 0.0   ;;  %v81_v2 = vld [vmem:[#allocation4] sm:$0xff]  ;;  %v261_v34 = vlaneseq }
  0x4b   :  { %427 = vmatprep.subr.bf16.mxu0 %v567_v0  ;;  %413 = vmatprep.mubr.msk.f32.mxu0 %vm568_vm0, %v569_v1  ;;  %v82_v3 = vld [vmem:[#allocation4 + $0x8] sm:$0xff]  ;;  %v165_v5 = vld [vmem:[%s692_s3] sm:$0xff]  ;;  %v166_v6 = vld [vmem:[%s692_s3 + $0x8] sm:$0xff]  ;;  %vm90_vm1 = vcmask 130048   ;;  %vm176_vm2 = vcmask 261120  }
  0x4c   :  { %430 = vmatprep.subr.bf16.mxu1 %v567_v0  ;;  %424 = vmatprep.mubr.msk.f32.mxu1 %vm568_vm0, %v569_v1  ;;  %v428_v4 = vpack.c.bf16 %v82_v3, %v81_v2  ;;  %v431_v7 = vpack.c.bf16 %v166_v6, %v165_v5  ;;  %v80_v8 = vld [vmem:[#allocation2] sm:$0xff]  ;;  %v167_v9 = vld [vmem:[%s692_s3 + $0x10] sm:$0xff]  ;;  %v168_v10 = vld [vmem:[%s692_s3 + $0x18] sm:$0xff]  ;;  %v262_v35 = vshrl.u32 %v261_v34, 7 }
  0x4d   :  { %v434_v11 = vpack.c.bf16 %v168_v10, %v167_v9  ;;  %v252_v12 = vld [vmem:[#allocation7 + $0x8] sm:$0xff]  ;;  %v254_v13 = vld [vmem:[#allocation7 + $0x18] sm:$0xff]  ;;  %v251_v14 = vld [vmem:[#allocation7] sm:$0xff]  ;;  %v379_v9 = vand.u32 127, %v261_v34 }
  0x4e   :  { %429 = vmatpush3.bf16.msra.mxu0 %v428_v4  ;;  %432 = vmatpush3.bf16.msra.mxu1 %v431_v7  ;;  %v436_v15 = vpack.c.bf16 %v254_v13, %v252_v12  ;;  %v253_v16 = vld [vmem:[#allocation7 + $0x10] sm:$0xff]  ;;  %v395_v18 = vld [vmem:[#allocation6] ss:$0 sm:$0xff]  ;;  %v256_v23 = vld [vmem:[#allocation7 + $0x28] sm:$0xff]  ;;  %v267_v36 = vsub.s32 1, %v262_v35  ;;  %v263_v47 = vsub.s32 0, %v262_v35 }
  0x4f   :  { %433 = vmatprep.subr.bf16.mxu1 %v567_v0  ;;  %v438_v17 = vpack.c.bf16 %v253_v16, %v251_v14  ;;  %v258_v24 = vld [vmem:[#allocation7 + $0x38] sm:$0xff]  ;;  %v255_v26 = vld [vmem:[#allocation7 + $0x20] sm:$0xff]  ;;  %v257_v27 = vld [vmem:[#allocation7 + $0x30] sm:$0xff]  ;;  %vm380_vm4 = vcmp.lt.s32.totalorder %v379_v9, 8  ;;  %vm385_vm5 = vcmp.eq.s32.totalorder %v379_v9, 8 }
  0x50   :  { %437 = vmatprep.subr.bf16.mxu0 %v436_v15  ;;  %v440_v25 = vpack.c.bf16 %v258_v24, %v256_v23  ;;  %v442_v28 = vpack.c.bf16 %v257_v27, %v255_v26  ;;  %v397_v29 = vld [vmem:[%s693_s4] ss:$0 sm:$0xff] }
  0x51   :  { %414 = vmatmul.mubr.msk.f32.vlgmr.msra.gmra.mrb[0].mxu0 %vm90_vm1, %v80_v8  ;;  %v259_v37 = vld [vmem:[%s695_s6] sm:$0x3] }
  0x52   :  { %338 = vmatprep.mubr.f32.mxu0 %v569_v1  ;;  %435 = vmatpush3.bf16.msra.mxu1 %v434_v11  ;;  %v268_v38 = vrot.slane %v259_v37, %v267_v36  ;;  %v264_v48 = vrot.slane %v259_v37, %v263_v47  ;;  %v351_v50 = vld [vmem:[%s696_s7] sm:$0xff] }
  0x53   :  { %439 = vmatpush1.bf16.msra.mxu0 %v438_v17  ;;  %v370_v61 = vmul.f32 -0.5, %v351_v50 }
  0x54   :  { %441 = vmatprep.subr.bf16.mxu0 %v440_v25 }
  0x55   :  { %v371_v1 = vmul.f32 %v370_v61, %v351_v50 }
  0x57   :  { %443 = vmatpush1.bf16.msra.mxu0 %v442_v28 }
 0x124   :  { %v160_v19 = vpop.f32.mrb[0].mxu0 }
 0x125   :  { %v161_v20 = vadd.f32 %v395_v18, %v160_v19  ;;  %v415_v21 = vpop.f32.mrb[1].mxu0 }
 0x127   :  { %v164_v22 = vmax.f32 %v161_v20, 0.0 }
 0x129   :  { %425 = vmatmul.mubr.msk.f32.vlgmr.msra.gmra.mrb[0].mxu1 %vm176_vm2, %v164_v22 }
 0x1fc   :  { %v246_v30 = vpop.f32.mrb[0].mxu1 }
 0x1fd   :  { %v247_v31 = vadd.f32 %v397_v29, %v246_v30  ;;  %v426_v32 = vpop.f32.mrb[1].mxu1 }
 0x1ff   :  { %v250_v33 = vmax.f32 %v247_v31, 0.0 }
 0x201   :  { %399 = vmatmul.mubr.msk.f32.vlgmr.msra.gmra.mrb[2].mxu0 %vm176_vm2, %v250_v33 }
 0x2d4   :  { %v340_v39 = vpop.f32.mrb[2].mxu0 }
 0x2d5   :  { %v342_v40 = vpop.f32.mrb[3].mxu0  ;;  %v341_v51 = vadd.f32 %v340_v39, %v264_v48 }
 0x2d6   :  { %v343_v41 = vadd.f32 %v342_v40, %v268_v38 }
 0x2d8   :  { %455 = vtanh.f32 %v343_v41 }
 0x2e2   :  { %v456_v42 = vpop.eup %455 }
 0x2e3   :  { %v346_v43 = vadd.f32 1.0, %v456_v42 }
 0x2e5   :  { %v347_v44 = vmul.f32 11.0, %v346_v43 }
 0x2e7   :  { %v348_v45 = vadd.f32 -20.0, %v347_v44 }
 0x2e9   :  { %v349_v46 = vmul.f32 1.442695, %v348_v45  ;;  %v372_v7 = vsub.f32 %v371_v1, %v348_v45 }
 0x2eb   :  { %457 = vpow2.f32 %v349_v46  ;;  %v400_v11 = vadd.f32 -0.9189385, %v372_v7 }
 0x2f5   :  { %v458_v49 = vpop.eup %457 }
 0x2f6   :  { %v352_v52 = vmul.f32 %v458_v49, %v351_v50 }
 0x2f8   :  { %v353_v53 = vadd.f32 %v352_v52, %v341_v51 }
 0x2fa   :  { %v354_v54 = vmul.f32 -2.0, %v353_v53  ;;  %v374_v8 = vsub.f32 0.6931472, %v353_v53 }
 0x2fc   :  { %v356_v55 = vand.u32 2147483647, %v354_v54  ;;  %v355_v4 = vmax.f32 %v354_v54, 0.0 }
 0x2fe   :  { %v357_v56 = vsub.f32 0.0, %v356_v55 }
 0x300   :  { %v358_v57 = vmul.f32 1.442695, %v357_v56 }
 0x302   :  { %459 = vpow2.f32 %v358_v57 }
 0x30c   :  { %v460_v58 = vpop.eup %459 }
 0x30d   :  { %v360_v59 = vadd.f32 1.0, %v460_v58  ;;  %v363_v60 = vmul.f32 -0.5, %v460_v58  ;;  %v366_v63 = vand.u32 2147483647, %v460_v58 }
 0x30f   :  { %461 = vlog2.f32 %v360_v59  ;;  %v364_v62 = vadd.f32 1.0, %v363_v60  ;;  %vm367_vm3 = vcmp.lt.f32.partialorder %v366_v63, 0.0004427343 }
 0x310   :  { %463 = vtanh.f32 %v353_v53 }
 0x311   :  { %v365_v3 = vmul.f32 %v460_v58, %v364_v62 }
 0x319   :  { %v462_v0 = vpop.eup %461 }
 0x31a   :  { %v362_v2 = vmul.f32 0.6931472, %v462_v0  ;;  %v464_v15 = vpop.eup %463 }
 0x31c   :  { %v368_v5 = vsel %vm367_vm3, %v365_v3, %v362_v2 }
 0x31d   :  { %v369_v6 = vadd.f32 %v368_v5, %v355_v4 }
 0x31f   :  { %v375_v10 = vsub.f32 %v374_v8, %v369_v6 }
 0x321   :  { %v376_v12 = vmul.f32 2.0, %v375_v10 }
 0x323   :  { %v377_v13 = vsub.f32 %v400_v11, %v376_v12 }
 0x325   :  { %v381_v14 = vsel %vm380_vm4, %v377_v13, 0.0 }
 0x326   :  { %382 = vadd.xlane.f32.xlu0 %v381_v14 }
 0x3b3   :  { %v383_v16 = vpop.xlane.xlu0 %382 }
 0x3b4   :  { %v386_v17 = vsel %vm385_vm5, %v383_v16, %v464_v15 }
 0x3b5   :  { %387 = vst [vmem:[%s697_s8] sm:$0xff] %v386_v17 }
 0x3b6   :  { %392 = vsyncpa [#allocation3], 1 }
 0x3b7   :  { %393 = vsyncpa [#allocation5], 1 }
 0x3b8   :  { %394 = vsyncpa [#allocation8], 1 }

</bundles_post_ra>
